<compile_context>
chip_gen: v7x
topology: tpu7x:2x2x1
jax: 0.10.0
libtpu: 0.0.40
codegen_flags: <defaults>
</compile_context>

<pallas_src>
import functools

import jax
import jax.numpy as jnp
from jax.experimental import pallas as pl
from jax.experimental.pallas import tpu as pltpu

LN_EPS = 1e-5


def _gelu_exact(x):
    # PyTorch nn.GELU() default = exact erf formulation.
    return 0.5 * x * (1.0 + jax.lax.erf(x * (1.0 / jnp.sqrt(2.0).astype(x.dtype))))


def catformer_ffn_kernel(x_ref, gamma_ref, beta_ref, w1_ref, b1_ref, w2_ref, b2_ref,
                         out_ref):
    x = x_ref[...].astype(jnp.float32)                       # (tm, d_in)

    # --- LayerNorm over last dim (biased variance, eps=1e-5, affine), stats in f32 ---
    mean = jnp.mean(x, axis=-1, keepdims=True)
    xc = x - mean
    var = jnp.mean(xc * xc, axis=-1, keepdims=True)
    inv = jax.lax.rsqrt(var + LN_EPS)
    x_ln = xc * inv * gamma_ref[...].astype(jnp.float32) + beta_ref[...].astype(jnp.float32)

    # --- Linear(d_in -> 4*embed) + GELU ---
    # Matmul in the weights' native dtype (no f32 weight copies); accumulate in f32.
    h = jnp.dot(x_ln.astype(w1_ref.dtype), w1_ref[...],
                preferred_element_type=jnp.float32) + b1_ref[...].astype(jnp.float32)
    h = _gelu_exact(h)

    # --- Linear(4*embed -> embed); Dropout(p=0.0) is the identity ---
    y = jnp.dot(h.astype(w2_ref.dtype), w2_ref[...],
                preferred_element_type=jnp.float32) + b2_ref[...].astype(jnp.float32)

    out_ref[...] = y.astype(out_ref.dtype)


def _round_up(n, m):
    return ((n + m - 1) // m) * m


@functools.partial(jax.jit, static_argnames=("row_block",))
def catformer_ffn(x, gamma, beta, w1, b1, w2, b2, *, row_block=256):
    """x: (batch, seq, d_in). Returns (batch, seq, embed_dim)."""
    batch, seq, d_in = x.shape
    hidden = w1.shape[1]
    d_out = w2.shape[1]

    rows = batch * seq
    # One MXU-sized slab of rows per grid step; never bigger than the (padded) input.
    rb = min(row_block, _round_up(rows, 8))
    rows_padded = _round_up(rows, rb)

    x2d = x.reshape(rows, d_in)
    if rows_padded != rows:
        x2d = jnp.pad(x2d, ((0, rows_padded - rows), (0, 0)))

    # Biases / LN params as (1, N) rows (lane-major) so they broadcast cheaply.
    gamma2 = gamma.reshape(1, d_in)
    beta2 = beta.reshape(1, d_in)
    b1_2 = b1.reshape(1, hidden)
    b2_2 = b2.reshape(1, d_out)

    grid = (rows_padded // rb,)

    # VMEM budget: resident params (single-buffered) + double-buffered x/out tiles
    # + f32 intermediates, with headroom; capped at 64 MiB (v7x per-core VMEM).
    param_bytes = (w1.size * w1.dtype.itemsize + w2.size * w2.dtype.itemsize
                   + b1.size * b1.dtype.itemsize + b2.size * b2.dtype.itemsize
                   + gamma.size * gamma.dtype.itemsize + beta.size * beta.dtype.itemsize)
    act_bytes = 2 * rb * (d_in + d_out) * x.dtype.itemsize
    tmp_bytes = rb * (d_in + hidden + d_out) * 4
    vmem_limit = min(64 * 1024 * 1024,
                     int(1.5 * (param_bytes + act_bytes + tmp_bytes)) + (4 << 20))

    cost = pl.CostEstimate(
        flops=2 * rows_padded * d_in * hidden + 2 * rows_padded * hidden * d_out,
        transcendentals=rows_padded * hidden,            # erf inside GELU
        bytes_accessed=rows_padded * (d_in + d_out) * x.dtype.itemsize + param_bytes,
    )

    # Whole-array, VMEM-resident specs for parameters: single-buffered, fetched once.
    vmem_full = lambda: pl.BlockSpec(memory_space=pltpu.MemorySpace.VMEM)

    out = pl.pallas_call(
        catformer_ffn_kernel,
        out_shape=jax.ShapeDtypeStruct((rows_padded, d_out), x.dtype),
        grid_spec=pltpu.PrefetchScalarGridSpec(
            num_scalar_prefetch=0,
            grid=grid,
            in_specs=[
                pl.BlockSpec((rb, d_in), lambda i: (i, 0)),   # x rows (pipelined)
                vmem_full(),                                  # ln gamma
                vmem_full(),                                  # ln beta
                vmem_full(),                                  # w1
                vmem_full(),                                  # b1
                vmem_full(),                                  # w2
                vmem_full(),                                  # b2
            ],
            out_specs=pl.BlockSpec((rb, d_out), lambda i: (i, 0)),
        ),
        compiler_params=pltpu.CompilerParams(
            dimension_semantics=("parallel",),
            vmem_limit_bytes=vmem_limit),
        cost_estimate=cost,
    )(x2d, gamma2, beta2, w1, b1_2, w2, b2_2)

    return out[:rows].reshape(batch, seq, d_out)


def init_params(key, index_of_layer, embed_dim, dtype=jnp.float32):
    d_in = index_of_layer * embed_dim
    hidden = 4 * embed_dim
    k1, k2, k3, k4 = jax.random.split(key, 4)
    # Deterministic synthetic init (roughly matching PyTorch Linear scale).
    w1 = jax.random.uniform(k1, (d_in, hidden), dtype, -1.0, 1.0) / jnp.sqrt(d_in)
    b1 = jax.random.uniform(k2, (hidden,), dtype, -1.0, 1.0) / jnp.sqrt(d_in)
    w2 = jax.random.uniform(k3, (hidden, embed_dim), dtype, -1.0, 1.0) / jnp.sqrt(hidden)
    b2 = jax.random.uniform(k4, (embed_dim,), dtype, -1.0, 1.0) / jnp.sqrt(hidden)
    gamma = jnp.ones((d_in,), dtype)   # nn.LayerNorm default weight
    beta = jnp.zeros((d_in,), dtype)   # nn.LayerNorm default bias
    return gamma, beta, w1, b1, w2, b2


def reference_ffn(x, gamma, beta, w1, b1, w2, b2):
    mean = jnp.mean(x, axis=-1, keepdims=True)
    var = jnp.mean((x - mean) ** 2, axis=-1, keepdims=True)
    x_ln = (x - mean) * jax.lax.rsqrt(var + LN_EPS) * gamma + beta
    h = jax.nn.gelu(x_ln @ w1 + b1, approximate=False)
    return h @ w2 + b2


if __name__ == "__main__":
    # Small shapes consistent with CatformerFFN(index_of_layer=1, embed_dim=128):
    # x: (batch=2, seq=8, d_in=128) -> out: (2, 8, 128)
    index_of_layer, embed_dim = 1, 128
    batch, seq = 2, 8

    key = jax.random.PRNGKey(0)
    kx, kp = jax.random.split(key)
    x = jax.random.normal(kx, (batch, seq, index_of_layer * embed_dim), jnp.float32)
    params = init_params(kp, index_of_layer, embed_dim)

    out = catformer_ffn(x, *params)
    out = jax.block_until_ready(out)

    ref = reference_ffn(x, *params)
    assert out.shape == (batch, seq, embed_dim)
    assert jnp.allclose(out, ref, atol=2e-4, rtol=2e-4), "mismatch vs reference"

    print("KERNEL_OK")
</pallas_src>

<mosaic_0001>
module attributes {stable_mosaic.version = 11 : i64} {
  func.func @catformer_ffn_kernel(%arg0: i32, %arg1: memref<16x128xf32, #tpu.memory_space<vmem>>, %arg2: memref<1x128xf32, #tpu.memory_space<vmem>>, %arg3: memref<1x128xf32, #tpu.memory_space<vmem>>, %arg4: memref<128x512xf32, #tpu.memory_space<vmem>>, %arg5: memref<1x512xf32, #tpu.memory_space<vmem>>, %arg6: memref<512x128xf32, #tpu.memory_space<vmem>>, %arg7: memref<1x128xf32, #tpu.memory_space<vmem>>, %arg8: memref<16x128xf32, #tpu.memory_space<vmem>>) attributes {dimension_semantics = [#tpu.dimension_semantics<parallel>], iteration_bounds = array<i64: 1>, scalar_prefetch = 0 : i64, scratch_operands = 0 : i64, tpu.core_type = #tpu.core_type<tc>, window_params = [{transform_indices = @transform_0, window_bounds = array<i64: 16, 128>}, {pipeline_mode = #tpu.pipeline_mode<synchronous>, transform_indices = @transform_1, window_bounds = array<i64: 1, 128>}, {pipeline_mode = #tpu.pipeline_mode<synchronous>, transform_indices = @transform_2, window_bounds = array<i64: 1, 128>}, {pipeline_mode = #tpu.pipeline_mode<synchronous>, transform_indices = @transform_3, window_bounds = array<i64: 128, 512>}, {pipeline_mode = #tpu.pipeline_mode<synchronous>, transform_indices = @transform_4, window_bounds = array<i64: 1, 512>}, {pipeline_mode = #tpu.pipeline_mode<synchronous>, transform_indices = @transform_5, window_bounds = array<i64: 512, 128>}, {pipeline_mode = #tpu.pipeline_mode<synchronous>, transform_indices = @transform_6, window_bounds = array<i64: 1, 128>}, {transform_indices = @transform_7, window_bounds = array<i64: 16, 128>}]} {
    %c0 = arith.constant 0 : index
    %c0_0 = arith.constant 0 : index
    %0 = vector.load %arg1[%c0, %c0_0] : memref<16x128xf32, #tpu.memory_space<vmem>>, vector<16x128xf32>
    %cst = arith.constant dense<0.000000e+00> : vector<16xf32>
    %1 = vector.multi_reduction <add>, %0, %cst [1] : vector<16x128xf32> to vector<16xf32>
    %2 = vector.shape_cast %1 : vector<16xf32> to vector<16x1xf32>
    %cst_1 = arith.constant 1.280000e+02 : f32
    %3 = vector.broadcast %cst_1 : f32 to vector<16x1xf32>
    %4 = arith.divf %2, %3 : vector<16x1xf32>
    %5 = vector.broadcast %4 : vector<16x1xf32> to vector<16x128xf32>
    %6 = arith.subf %0, %5 : vector<16x128xf32>
    %7 = arith.mulf %6, %6 : vector<16x128xf32>
    %cst_2 = arith.constant dense<0.000000e+00> : vector<16xf32>
    %8 = vector.multi_reduction <add>, %7, %cst_2 [1] : vector<16x128xf32> to vector<16xf32>
    %9 = vector.shape_cast %8 : vector<16xf32> to vector<16x1xf32>
    %cst_3 = arith.constant 1.280000e+02 : f32
    %10 = vector.broadcast %cst_3 : f32 to vector<16x1xf32>
    %11 = arith.divf %9, %10 : vector<16x1xf32>
    %cst_4 = arith.constant 9.99999974E-6 : f32
    %12 = vector.broadcast %cst_4 : f32 to vector<16x1xf32>
    %13 = arith.addf %11, %12 : vector<16x1xf32>
    %14 = math.rsqrt %13 : vector<16x1xf32>
    %15 = vector.broadcast %14 : vector<16x1xf32> to vector<16x128xf32>
    %16 = arith.mulf %6, %15 : vector<16x128xf32>
    %c0_5 = arith.constant 0 : index
    %c0_6 = arith.constant 0 : index
    %17 = vector.load %arg2[%c0_5, %c0_6] : memref<1x128xf32, #tpu.memory_space<vmem>>, vector<1x128xf32>
    %18 = vector.broadcast %17 : vector<1x128xf32> to vector<16x128xf32>
    %19 = arith.mulf %16, %18 : vector<16x128xf32>
    %c0_7 = arith.constant 0 : index
    %c0_8 = arith.constant 0 : index
    %20 = vector.load %arg3[%c0_7, %c0_8] : memref<1x128xf32, #tpu.memory_space<vmem>>, vector<1x128xf32>
    %21 = vector.broadcast %20 : vector<1x128xf32> to vector<16x128xf32>
    %22 = arith.addf %19, %21 : vector<16x128xf32>
    %c0_9 = arith.constant 0 : index
    %c0_10 = arith.constant 0 : index
    %23 = vector.load %arg4[%c0_9, %c0_10] : memref<128x512xf32, #tpu.memory_space<vmem>>, vector<128x512xf32>
    %cst_11 = arith.constant dense<0.000000e+00> : vector<16x512xf32>
    %24 = tpu.matmul %22, %23, %cst_11 {dimension_numbers = #tpu.dot_dimension_numbers<[1], [0], [0], [1], [0, 0, 1, 1], [], []>} : vector<16x128xf32>, vector<128x512xf32>, vector<16x512xf32> -> vector<16x512xf32>
    %c0_12 = arith.constant 0 : index
    %c0_13 = arith.constant 0 : index
    %25 = vector.load %arg5[%c0_12, %c0_13] : memref<1x512xf32, #tpu.memory_space<vmem>>, vector<1x512xf32>
    %26 = vector.broadcast %25 : vector<1x512xf32> to vector<16x512xf32>
    %27 = arith.addf %24, %26 : vector<16x512xf32>
    %cst_14 = arith.constant 5.000000e-01 : f32
    %28 = vector.broadcast %cst_14 : f32 to vector<16x512xf32>
    %29 = arith.mulf %28, %27 : vector<16x512xf32>
    %cst_15 = arith.constant 2.000000e+00 : f32
    %30 = math.sqrt %cst_15 : f32
    %cst_16 = arith.constant 1.000000e+00 : f32
    %31 = arith.divf %cst_16, %30 : f32
    %32 = vector.broadcast %31 : f32 to vector<16x512xf32>
    %33 = arith.mulf %27, %32 : vector<16x512xf32>
    %34 = math.erf %33 : vector<16x512xf32>
    %cst_17 = arith.constant 1.000000e+00 : f32
    %35 = vector.broadcast %cst_17 : f32 to vector<16x512xf32>
    %36 = arith.addf %35, %34 : vector<16x512xf32>
    %37 = arith.mulf %29, %36 : vector<16x512xf32>
    %c0_18 = arith.constant 0 : index
    %c0_19 = arith.constant 0 : index
    %38 = vector.load %arg6[%c0_18, %c0_19] : memref<512x128xf32, #tpu.memory_space<vmem>>, vector<512x128xf32>
    %cst_20 = arith.constant dense<0.000000e+00> : vector<16x128xf32>
    %39 = tpu.matmul %37, %38, %cst_20 {dimension_numbers = #tpu.dot_dimension_numbers<[1], [0], [0], [1], [0, 0, 1, 1], [], []>} : vector<16x512xf32>, vector<512x128xf32>, vector<16x128xf32> -> vector<16x128xf32>
    %c0_21 = arith.constant 0 : index
    %c0_22 = arith.constant 0 : index
    %40 = vector.load %arg7[%c0_21, %c0_22] : memref<1x128xf32, #tpu.memory_space<vmem>>, vector<1x128xf32>
    %41 = vector.broadcast %40 : vector<1x128xf32> to vector<16x128xf32>
    %42 = arith.addf %39, %41 : vector<16x128xf32>
    %c0_23 = arith.constant 0 : index
    %c0_24 = arith.constant 0 : index
    %43 = vector.load %arg8[%c0_23, %c0_24] : memref<16x128xf32, #tpu.memory_space<vmem>>, vector<16x128xf32>
    tpu.vector_store %arg8[%c0_23, %c0_24], %42 {strides = array<i32>} : memref<16x128xf32, #tpu.memory_space<vmem>>, vector<16x128xf32>,
    return
  }
  func.func @transform_0(%arg0: i32) -> (i32, i32) {
    %c0_i32 = arith.constant 0 : i32
    %c0_i32_0 = arith.constant 0 : i32
    return %arg0, %c0_i32 : i32, i32
  }
  func.func @transform_1(%arg0: i32) -> (i32, i32) {
    %c0_i32 = arith.constant 0 : i32
    %c0_i32_0 = arith.constant 0 : i32
    %c0_i32_1 = arith.constant 0 : i32
    return %c0_i32, %c0_i32_0 : i32, i32
  }
  func.func @transform_2(%arg0: i32) -> (i32, i32) {
    %c0_i32 = arith.constant 0 : i32
    %c0_i32_0 = arith.constant 0 : i32
    %c0_i32_1 = arith.constant 0 : i32
    return %c0_i32, %c0_i32_0 : i32, i32
  }
  func.func @transform_3(%arg0: i32) -> (i32, i32) {
    %c0_i32 = arith.constant 0 : i32
    %c0_i32_0 = arith.constant 0 : i32
    %c0_i32_1 = arith.constant 0 : i32
    return %c0_i32, %c0_i32_0 : i32, i32
  }
  func.func @transform_4(%arg0: i32) -> (i32, i32) {
    %c0_i32 = arith.constant 0 : i32
    %c0_i32_0 = arith.constant 0 : i32
    %c0_i32_1 = arith.constant 0 : i32
    return %c0_i32, %c0_i32_0 : i32, i32
  }
  func.func @transform_5(%arg0: i32) -> (i32, i32) {
    %c0_i32 = arith.constant 0 : i32
    %c0_i32_0 = arith.constant 0 : i32
    %c0_i32_1 = arith.constant 0 : i32
    return %c0_i32, %c0_i32_0 : i32, i32
  }
  func.func @transform_6(%arg0: i32) -> (i32, i32) {
    %c0_i32 = arith.constant 0 : i32
    %c0_i32_0 = arith.constant 0 : i32
    %c0_i32_1 = arith.constant 0 : i32
    return %c0_i32, %c0_i32_0 : i32, i32
  }
  func.func @transform_7(%arg0: i32) -> (i32, i32) {
    %c0_i32 = arith.constant 0 : i32
    %c0_i32_0 = arith.constant 0 : i32
    return %arg0, %c0_i32 : i32, i32
  }
}

</mosaic_0001>

<bundles_post_ra>
// kernel: catformer_ffn.1
= control target key start
LH: loop header
LB: loop body
LE: loop exit
PB: predicated region body
PF: predicated region fallthrough
CT: control target
= control target key end

     0   :  { %12 = vsyncpa [#allocation3], 0  ;;  %s1048_s0 = inlined_call_operand.vmem [shape: f32[16,128], index: 0, kind: input, shape index: {}]   ;;  %s1049_s1 = inlined_call_operand.vmem [shape: f32[1,128], index: 1, kind: input, shape index: {}]   ;;  %s1050_s2 = inlined_call_operand.vmem [shape: f32[1,128], index: 2, kind: input, shape index: {}]   ;;  %s1051_s3 = inlined_call_operand.hbm [shape: f32[128,512], index: 3, kind: input, shape index: {}]   ;;  %s1052_s4 = inlined_call_operand.vmem [shape: f32[1,512], index: 4, kind: input, shape index: {}]   ;;  %s1053_s5 = inlined_call_operand.hbm [shape: f32[512,128], index: 5, kind: input, shape index: {}]   ;;  %s1054_s6 = inlined_call_operand.vmem [shape: f32[1,128], index: 6, kind: input, shape index: {}]   ;;  %s1055_s7 = inlined_call_operand.hbm [shape: f32[16,128], index: 7, kind: output, shape index: {}]  }
   0x1   :  { %13 = vsyncpa [#allocation6], 0 }
   0x2   :  { %14 = vsyncpa [#allocation4], 0  ;;  %s926_s24 = smov [#allocation2]   ;;  %s854_s28 = scalar_lea.hbm %s1051_s3, 8192 }
   0x3   :  { %s26_s25 = sshll.u32 %s926_s24, 4  ;;  %p855_p0 = scmp.ne.s32.totalorder %s1051_s3, %s854_s28  ;;  %s27_s25 = int_to_ptr.vmem [resolvable:$true] %s26_s25 }
   0x4   :  { %p858_p1 = scmp.lt.u32.totalorder %s854_s28, %s1051_s3 }
   0x6   :  { %p860_p2 = pnand %p858_p1, %p855_p0 }
   0x8   :  { %863 = shalt.err (!%p860_p2)
}
   0x9   :  { %s864_s10 = scalar_lea.vmem %s27_s25, 8192  ;;  %p869_p4 = scmp.lt.s32.totalorder %s27_s25, %s27_s25 }
   0xa   :  { %p865_p3 = scmp.ne.s32.totalorder %s27_s25, %s864_s10  ;;  %p870_p5 = scmp.lt.s32.totalorder %s864_s10, %s864_s10 }
   0xc   :  { %p871_p6 = por %p870_p5, %p869_p4 }
   0xe   :  { %p872_p7 = pnand %p871_p6, %p865_p3 }
  0x10   :  { %875 = shalt.err (!%p872_p7)
}
  0x11   :  { %s927_s11 = smov 512   ;;  %s928_s12 = smov 32  }
  0x12   :  { %32 = dma.hbm_to_vmem [thread:$0]  %s1051_s3, 8192, %s27_s25, [#allocation3], %s927_s11, %s927_s11, %s928_s12  }
  0x13   :  { %s929_s15 = smov [#allocation5]   ;;  %s876_s19 = scalar_lea.hbm %s1053_s5, 8192 }
  0x14   :  { %s40_s16 = sshll.u32 %s929_s15, 4  ;;  %p877_p8 = scmp.ne.s32.totalorder %s1053_s5, %s876_s19  ;;  %s41_s16 = int_to_ptr.vmem [resolvable:$true] %s40_s16 }
  0x15   :  { %p880_p9 = scmp.lt.u32.totalorder %s876_s19, %s1053_s5 }
  0x17   :  { %p882_p10 = pnand %p880_p9, %p877_p8 }
  0x19   :  { %885 = shalt.err (!%p882_p10)
}
  0x1a   :  { %s886_s24 = scalar_lea.vmem %s41_s16, 8192  ;;  %p891_p12 = scmp.lt.s32.totalorder %s41_s16, %s41_s16 }
  0x1b   :  { %p887_p11 = scmp.ne.s32.totalorder %s41_s16, %s886_s24  ;;  %p892_p13 = scmp.lt.s32.totalorder %s886_s24, %s886_s24 }
  0x1d   :  { %p893_p0 = por %p892_p13, %p891_p12 }
  0x1f   :  { %p894_p1 = pnand %p893_p0, %p887_p11 }
  0x21   :  { %897 = shalt.err (!%p894_p1)
}
  0x22   :  { %s930_s3 = smov 128   ;;  %s931_s25 = smov 8  }
  0x23   :  { %46 = dma.hbm_to_vmem [thread:$0]  %s1053_s5, 8192, %s41_s16, [#allocation6], %s930_s3, %s930_s3, %s931_s25  }
  0x24   :  { %920 = dma.done.wait [#allocation3], 8192  }
  0x25   :  { %921 = vsyncadd [#allocation3], 4294959104 }
  0x26   :  { %922 = dma.done.wait [#allocation6], 8192  }
  0x27   :  { %923 = vsyncadd [#allocation6], 4294959104  ;;  %v55_v0 = vld [vmem:[%s1048_s0] sm:$0xff]  ;;  %v56_v1 = vld [vmem:[%s1048_s0 + $0x8] sm:$0xff]  ;;  %s933_s12 = smov [#allocation7]  }
  0x28   :  { %57 = vadd.xlane.f32.xlu0 %v55_v0  ;;  %v99_v2 = vld [vmem:[#allocation2 + $0x8] sm:$0xff]  ;;  %v101_v4 = vld [vmem:[#allocation2 + $0x18] sm:$0xff]  ;;  %v98_v7 = vld [vmem:[#allocation2] sm:$0xff]  ;;  %s606_s13 = sshll.u32 %s933_s12, 4  ;;  %s607_s13 = int_to_ptr.vmem [resolvable:$true] %s606_s13 }
  0x29   :  { %v103_v3 = vld [vmem:[#allocation2 + $0x28] sm:$0xff]  ;;  %v105_v6 = vld [vmem:[#allocation2 + $0x38] sm:$0xff]  ;;  %v102_v8 = vld [vmem:[#allocation2 + $0x20] sm:$0xff]  ;;  %p903_p3 = scmp.lt.s32.totalorder %s607_s13, %s607_s13 }
  0x2a   :  { %v698_v5 = vpack.c.bf16 %v103_v3, %v99_v2  ;;  %v730_v9 = vpack.c.bf16 %v105_v6, %v101_v4  ;;  %v700_v10 = vpack.c.bf16 %v102_v8, %v98_v7  ;;  %v100_v11 = vld [vmem:[#allocation2 + $0x10] sm:$0xff]  ;;  %v107_v13 = vld [vmem:[#allocation2 + $0x48] sm:$0xff]  ;;  %v109_v16 = vld [vmem:[#allocation2 + $0x58] sm:$0xff] }
  0x2b   :  { %v104_v12 = vld [vmem:[#allocation2 + $0x30] sm:$0xff]  ;;  %v111_v15 = vld [vmem:[#allocation2 + $0x68] sm:$0xff]  ;;  %v113_v17 = vld [vmem:[#allocation2 + $0x78] sm:$0xff] }
  0x2c   :  { %59 = vadd.xlane.f32.xlu0 %v56_v1  ;;  %699 = vmatprep.subr.bf16.mxu0 %v698_v5  ;;  %v732_v14 = vpack.c.bf16 %v104_v12, %v100_v11  ;;  %v702_v18 = vpack.c.bf16 %v111_v15, %v107_v13  ;;  %v734_v19 = vpack.c.bf16 %v113_v17, %v109_v16  ;;  %v106_v20 = vld [vmem:[#allocation2 + $0x40] sm:$0xff]  ;;  %v108_v22 = vld [vmem:[#allocation2 + $0x50] sm:$0xff]  ;;  %v115_v25 = vld [vmem:[#allocation2 + $0x88] sm:$0xff] }
  0x2d   :  { %731 = vmatprep.subr.bf16.mxu1 %v730_v9  ;;  %701 = vmatpush1.bf16.msra.mxu0 %v700_v10  ;;  %v110_v21 = vld [vmem:[#allocation2 + $0x60] sm:$0xff]  ;;  %v112_v24 = vld [vmem:[#allocation2 + $0x70] sm:$0xff]  ;;  %v119_v26 = vld [vmem:[#allocation2 + $0xa8] sm:$0xff] }
  0x2e   :  { %733 = vmatpush1.bf16.msra.mxu1 %v732_v14  ;;  %v704_v23 = vpack.c.bf16 %v110_v21, %v106_v20  ;;  %703 = vmatprep.subr.bf16.mxu0 %v702_v18  ;;  %v736_v27 = vpack.c.bf16 %v112_v24, %v108_v22  ;;  %v706_v28 = vpack.c.bf16 %v119_v26, %v115_v25  ;;  %v117_v29 = vld [vmem:[#allocation2 + $0x98] sm:$0xff]  ;;  %v114_v31 = vld [vmem:[#allocation2 + $0x80] sm:$0xff]  ;;  %v116_v34 = vld [vmem:[#allocation2 + $0x90] sm:$0xff]  ;;  %v932_v22 = vmov 0.0  }
  0x2f   :  { %735 = vmatprep.subr.bf16.mxu1 %v734_v19  ;;  %v121_v30 = vld [vmem:[#allocation2 + $0xb8] sm:$0xff]  ;;  %v118_v33 = vld [vmem:[#allocation2 + $0xa0] sm:$0xff]  ;;  %v120_v35 = vld [vmem:[#allocation2 + $0xb0] sm:$0xff]  ;;  %248 = vmatprep.mubr.f32.mxu0 %v932_v22 }
  0x30   :  { %v738_v32 = vpack.c.bf16 %v121_v30, %v117_v29  ;;  %v708_v36 = vpack.c.bf16 %v118_v33, %v114_v31  ;;  %v740_v37 = vpack.c.bf16 %v120_v35, %v116_v34  ;;  %v123_v46 = vld [vmem:[#allocation2 + $0xc8] sm:$0xff]  ;;  %v125_v48 = vld [vmem:[#allocation2 + $0xd8] sm:$0xff]  ;;  %v122_v51 = vld [vmem:[#allocation2 + $0xc0] sm:$0xff]  ;;  %325 = vmatprep.mubr.f32.mxu1 %v932_v22 }
  0x31   :  { %705 = vmatpush1.bf16.msra.mxu0 %v704_v23  ;;  %v127_v47 = vld [vmem:[#allocation2 + $0xe8] sm:$0xff]  ;;  %v129_v50 = vld [vmem:[#allocation2 + $0xf8] sm:$0xff]  ;;  %v126_v52 = vld [vmem:[#allocation2 + $0xe0] sm:$0xff] }
  0x32   :  { %737 = vmatpush1.bf16.msra.mxu1 %v736_v27  ;;  %707 = vmatprep.subr.bf16.mxu0 %v706_v28  ;;  %v710_v49 = vpack.c.bf16 %v127_v47, %v123_v46  ;;  %v742_v53 = vpack.c.bf16 %v129_v50, %v125_v48  ;;  %v712_v54 = vpack.c.bf16 %v126_v52, %v122_v51  ;;  %v124_v55 = vld [vmem:[#allocation2 + $0xd0] sm:$0xff]  ;;  %v131_v58 = vld [vmem:[#allocation2 + $0x108] sm:$0xff]  ;;  %v133_v60 = vld [vmem:[#allocation2 + $0x118] sm:$0xff] }
  0x33   :  { %739 = vmatprep.subr.bf16.mxu1 %v738_v32  ;;  %v128_v56 = vld [vmem:[#allocation2 + $0xf0] sm:$0xff]  ;;  %v135_v59 = vld [vmem:[#allocation2 + $0x128] sm:$0xff]  ;;  %v137_v62 = vld [vmem:[#allocation2 + $0x138] sm:$0xff] }
  0x34   :  { %v744_v57 = vpack.c.bf16 %v128_v56, %v124_v55  ;;  %v714_v61 = vpack.c.bf16 %v135_v59, %v131_v58  ;;  %v130_v63 = vld [vmem:[#allocation2 + $0x100] sm:$0xff]  ;;  %v132_v3 = vld [vmem:[#allocation2 + $0x110] sm:$0xff]  ;;  %v139_v6 = vld [vmem:[#allocation2 + $0x148] sm:$0xff] }
  0x35   :  { %709 = vmatpush1.bf16.msra.mxu0 %v708_v36  ;;  %v136_v4 = vld [vmem:[#allocation2 + $0x130] sm:$0xff]  ;;  %v143_v7 = vld [vmem:[#allocation2 + $0x168] sm:$0xff]  ;;  %v141_v8 = vld [vmem:[#allocation2 + $0x158] sm:$0xff] }
  0x36   :  { %741 = vmatpush1.bf16.msra.mxu1 %v740_v37  ;;  %711 = vmatprep.subr.bf16.mxu0 %v710_v49  ;;  %v748_v5 = vpack.c.bf16 %v136_v4, %v132_v3  ;;  %v718_v9 = vpack.c.bf16 %v143_v7, %v139_v6  ;;  %v145_v10 = vld [vmem:[#allocation2 + $0x178] sm:$0xff]  ;;  %v138_v11 = vld [vmem:[#allocation2 + $0x140] sm:$0xff]  ;;  %v140_v15 = vld [vmem:[#allocation2 + $0x150] sm:$0xff] }
  0x37   :  { %743 = vmatprep.subr.bf16.mxu1 %v742_v53  ;;  %v142_v12 = vld [vmem:[#allocation2 + $0x160] sm:$0xff]  ;;  %v750_v13 = vpack.c.bf16 %v145_v10, %v141_v8  ;;  %v144_v16 = vld [vmem:[#allocation2 + $0x170] sm:$0xff]  ;;  %v147_v17 = vld [vmem:[#allocation2 + $0x188] sm:$0xff] }
  0x38   :  { %v720_v14 = vpack.c.bf16 %v142_v12, %v138_v11  ;;  %v752_v18 = vpack.c.bf16 %v144_v16, %v140_v15  ;;  %v151_v19 = vld [vmem:[#allocation2 + $0x1a8] sm:$0xff]  ;;  %v149_v20 = vld [vmem:[#allocation2 + $0x198] sm:$0xff]  ;;  %v146_v25 = vld [vmem:[#allocation2 + $0x180] sm:$0xff] }
  0x39   :  { %713 = vmatpush1.bf16.msra.mxu0 %v712_v54  ;;  %v153_v21 = vld [vmem:[#allocation2 + $0x1b8] sm:$0xff]  ;;  %v722_v23 = vpack.c.bf16 %v151_v19, %v147_v17  ;;  %v150_v26 = vld [vmem:[#allocation2 + $0x1a0] sm:$0xff]  ;;  %v148_v27 = vld [vmem:[#allocation2 + $0x190] sm:$0xff] }
  0x3a   :  { %745 = vmatpush1.bf16.msra.mxu1 %v744_v57  ;;  %715 = vmatprep.subr.bf16.mxu0 %v714_v61  ;;  %v754_v24 = vpack.c.bf16 %v153_v21, %v149_v20  ;;  %v724_v28 = vpack.c.bf16 %v150_v26, %v146_v25  ;;  %v152_v29 = vld [vmem:[#allocation2 + $0x1b0] sm:$0xff]  ;;  %v155_v30 = vld [vmem:[#allocation2 + $0x1c8] sm:$0xff]  ;;  %v157_v34 = vld [vmem:[#allocation2 + $0x1d8] sm:$0xff] }
  0x3b   :  { %v159_v31 = vld [vmem:[#allocation2 + $0x1e8] sm:$0xff]  ;;  %v756_v32 = vpack.c.bf16 %v152_v29, %v148_v27  ;;  %v161_v35 = vld [vmem:[#allocation2 + $0x1f8] sm:$0xff]  ;;  %v154_v36 = vld [vmem:[#allocation2 + $0x1c0] sm:$0xff] }
  0x3c   :  { %v726_v33 = vpack.c.bf16 %v159_v31, %v155_v30  ;;  %v758_v37 = vpack.c.bf16 %v161_v35, %v157_v34  ;;  %v395_v46 = vld [vmem:[#allocation5 + $0x88] sm:$0xff]  ;;  %v426_v47 = vld [vmem:[#allocation5 + $0x180] sm:$0xff]  ;;  %v397_v3 = vld [vmem:[#allocation5 + $0x98] sm:$0xff] }
  0x3d   :  { %v427_v49 = vld [vmem:[#allocation5 + $0x188] sm:$0xff]  ;;  %v619_v58 = vld [vmem:[%s1049_s1] ss:$0 sm:$0xff]  ;;  %v428_v4 = vld [vmem:[#allocation5 + $0x190] sm:$0xff] }
  0x3e   :  { %v794_v50 = vpack.c.bf16 %v427_v49, %v426_v47  ;;  %v378_v61 = vld [vmem:[#allocation5] sm:$0xff]  ;;  %v381_v11 = vld [vmem:[#allocation5 + $0x18] sm:$0xff]  ;;  %v431_v20 = vld [vmem:[#allocation5 + $0x1a8] sm:$0xff] }
  0x3f   :  { %v413_v15 = vld [vmem:[#allocation5 + $0x118] sm:$0xff]  ;;  %v398_v16 = vld [vmem:[#allocation5 + $0xa0] sm:$0xff]  ;;  %v383_v27 = vld [vmem:[#allocation5 + $0x28] sm:$0xff] }
  0x40   :  { %v430_v19 = vld [vmem:[#allocation5 + $0x1a0] sm:$0xff]  ;;  %v415_v29 = vld [vmem:[#allocation5 + $0x128] sm:$0xff]  ;;  %v433_v35 = vld [vmem:[#allocation5 + $0x1b8] sm:$0xff] }
  0x41   :  { %v802_v26 = vpack.c.bf16 %v431_v20, %v430_v19  ;;  %v434_v47 = vld [vmem:[#allocation5 + $0x1c0] sm:$0xff]  ;;  %v435_v49 = vld [vmem:[#allocation5 + $0x1c8] sm:$0xff]  ;;  %v441_v20 = vld [vmem:[#allocation5 + $0x1f8] sm:$0xff] }
  0xb5   :  { %v58_v38 = vpop.xlane.xlu0 %57 }
  0xb6   :  { %v62_v39 = vmul.f32 0.0078125, %v58_v38  ;;  %v158_v38 = vld [vmem:[#allocation2 + $0x1e0] sm:$0xff] }
  0xb8   :  { %v1007_v40 = vsub.f32 %v55_v0, %v62_v39  ;;  %v134_v0 = vld [vmem:[#allocation2 + $0x120] sm:$0xff]  ;;  %v156_v39 = vld [vmem:[#allocation2 + $0x1d0] sm:$0xff] }
  0xb9   :  { %v60_v41 = vpop.xlane.xlu0 %59  ;;  %v716_v2 = vpack.c.bf16 %v134_v0, %v130_v63  ;;  %v410_v63 = vld [vmem:[#allocation5 + $0x100] sm:$0xff]  ;;  %v411_v0 = vld [vmem:[#allocation5 + $0x108] sm:$0xff] }
  0xba   :  { %v63_v42 = vmul.f32 0.0078125, %v60_v41  ;;  %v66_v43 = vmul.f32 %v1007_v40, %v1007_v40  ;;  %v160_v41 = vld [vmem:[#allocation2 + $0x1f0] sm:$0xff]  ;;  %v796_v10 = vpack.c.bf16 %v411_v0, %v410_v63  ;;  %v389_v63 = vld [vmem:[#allocation5 + $0x58] sm:$0xff] }
  0xbb   :  { %717 = vmatpush1.bf16.msra.mxu0 %v716_v2 }
  0xbc   :  { %v1011_v44 = vsub.f32 %v56_v1, %v63_v42  ;;  %68 = vadd.xlane.f32.xlu1 %v66_v43  ;;  %v746_v1 = vpack.c.bf16 %v137_v62, %v133_v60  ;;  %719 = vmatprep.subr.bf16.mxu0 %v718_v9  ;;  %v728_v42 = vpack.c.bf16 %v158_v38, %v154_v36  ;;  %v620_v60 = vld [vmem:[%s1050_s2] ss:$0 sm:$0xff]  ;;  %v379_v62 = vld [vmem:[#allocation5 + $0x8] sm:$0xff]  ;;  %v384_v36 = vld [vmem:[#allocation5 + $0x30] sm:$0xff] }
  0xbd   :  { %v760_v43 = vpack.c.bf16 %v160_v41, %v156_v39  ;;  %v764_v9 = vpack.c.bf16 %v379_v62, %v378_v61  ;;  %v416_v41 = vld [vmem:[#allocation5 + $0x130] sm:$0xff]  ;;  %v437_v61 = vld [vmem:[#allocation5 + $0x1d8] sm:$0xff] }
  0xbe   :  { %v67_v45 = vmul.f32 %v1011_v44, %v1011_v44  ;;  %747 = vmatprep.subr.bf16.mxu1 %v746_v1  ;;  %v396_v1 = vld [vmem:[#allocation5 + $0x90] sm:$0xff] }
  0xbf   :  { %749 = vmatpush1.bf16.msra.mxu1 %v748_v5  ;;  %721 = vmatpush1.bf16.msra.mxu0 %v720_v14  ;;  %v429_v5 = vld [vmem:[#allocation5 + $0x198] sm:$0xff]  ;;  %v766_v12 = vpack.c.bf16 %v397_v3, %v396_v1  ;;  %v412_v14 = vld [vmem:[#allocation5 + $0x110] sm:$0xff] }
  0xc0   :  { %70 = vadd.xlane.f32.xlu1 %v67_v45  ;;  %751 = vmatprep.subr.bf16.mxu1 %v750_v13  ;;  %v394_v45 = vld [vmem:[#allocation5 + $0x80] sm:$0xff]  ;;  %v798_v13 = vpack.c.bf16 %v429_v5, %v428_v4  ;;  %v388_v62 = vld [vmem:[#allocation5 + $0x50] sm:$0xff]  ;;  %v421_v3 = vld [vmem:[#allocation5 + $0x158] sm:$0xff] }
  0xc1   :  { %723 = vmatprep.subr.bf16.mxu0 %v722_v23  ;;  %v762_v48 = vpack.c.bf16 %v395_v46, %v394_v45  ;;  %v800_v23 = vpack.c.bf16 %v413_v15, %v412_v14  ;;  %v402_v45 = vld [vmem:[#allocation5 + $0xc0] sm:$0xff]  ;;  %v403_v46 = vld [vmem:[#allocation5 + $0xc8] sm:$0xff]  ;;  %v784_v1 = vpack.c.bf16 %v389_v63, %v388_v62 }
  0xc2   :  { %v406_v5 = vld [vmem:[#allocation5 + $0xe0] sm:$0xff]  ;;  %v423_v14 = vld [vmem:[#allocation5 + $0x168] sm:$0xff] }
  0xc3   :  { %753 = vmatpush1.bf16.msra.mxu1 %v752_v18  ;;  %725 = vmatpush1.bf16.msra.mxu0 %v724_v28  ;;  %v399_v18 = vld [vmem:[#allocation5 + $0xa8] sm:$0xff]  ;;  %v414_v28 = vld [vmem:[#allocation5 + $0x120] sm:$0xff] }
  0xc4   :  { %755 = vmatprep.subr.bf16.mxu1 %v754_v24  ;;  %727 = vmatprep.subr.bf16.mxu0 %v726_v33  ;;  %v382_v24 = vld [vmem:[#allocation5 + $0x20] sm:$0xff]  ;;  %v770_v25 = vpack.c.bf16 %v399_v18, %v398_v16  ;;  %v804_v31 = vpack.c.bf16 %v415_v29, %v414_v28  ;;  %v432_v33 = vld [vmem:[#allocation5 + $0x1b0] sm:$0xff]  ;;  %v164_v28 = vlaneseq }
  0xc5   :  { %v772_v30 = vpack.c.bf16 %v383_v27, %v382_v24  ;;  %v806_v38 = vpack.c.bf16 %v433_v35, %v432_v33  ;;  %v408_v16 = vld [vmem:[#allocation5 + $0xf0] sm:$0xff] }
  0xc6   :  { %v440_v18 = vld [vmem:[#allocation5 + $0x1f0] sm:$0xff]  ;;  %v165_v29 = vshrl.u32 %v164_v28, 7 }
  0xc7   :  { %757 = vmatpush1.bf16.msra.mxu1 %v756_v32  ;;  %729 = vmatpush1.bf16.msra.mxu0 %v728_v42  ;;  %v401_v32 = vld [vmem:[#allocation5 + $0xb8] sm:$0xff] }
  0xc8   :  { %759 = vmatprep.subr.bf16.mxu1 %v758_v37  ;;  %763 = vmatprep.subr.bf16.mxu0 %v762_v48  ;;  %v385_v37 = vld [vmem:[#allocation5 + $0x38] sm:$0xff]  ;;  %v778_v48 = vpack.c.bf16 %v403_v46, %v402_v45  ;;  %v178_v33 = vsub.s32 3, %v165_v29 }
  0xc9   :  { %v776_v39 = vpack.c.bf16 %v385_v37, %v384_v36  ;;  %v417_v42 = vld [vmem:[#allocation5 + $0x138] sm:$0xff] }
  0xcb   :  { %761 = vmatpush1.bf16.msra.mxu1 %v760_v43  ;;  %v808_v43 = vpack.c.bf16 %v417_v42, %v416_v41 }
  0xcc   :  { %795 = vmatprep.subr.bf16.mxu1 %v794_v50  ;;  %v386_v50 = vld [vmem:[#allocation5 + $0x40] sm:$0xff] }
 0x149   :  { %v69_v51 = vpop.xlane.xlu1 %68 }
 0x14a   :  { %v72_v52 = vmul.f32 0.0078125, %v69_v51  ;;  %v387_v51 = vld [vmem:[#allocation5 + $0x48] sm:$0xff] }
 0x14c   :  { %v74_v53 = vadd.f32 1e-05, %v72_v52  ;;  %v810_v52 = vpack.c.bf16 %v435_v49, %v434_v47 }
 0x14d   :  { %v71_v54 = vpop.xlane.xlu1 %70 }
 0x14e   :  { %834 = vrsqrt.f32 %v74_v53  ;;  %v73_v55 = vmul.f32 0.0078125, %v71_v54  ;;  %v780_v53 = vpack.c.bf16 %v387_v51, %v386_v50  ;;  %v418_v54 = vld [vmem:[#allocation5 + $0x140] sm:$0xff] }
 0x150   :  { %v75_v56 = vadd.f32 1e-05, %v73_v55  ;;  %v419_v55 = vld [vmem:[#allocation5 + $0x148] sm:$0xff] }
 0x152   :  { %836 = vrsqrt.f32 %v75_v56  ;;  %v812_v56 = vpack.c.bf16 %v419_v55, %v418_v54 }
 0x158   :  { %v835_v57 = vpop.eup %834 }
 0x159   :  { %v78_v59 = vmul.f32 %v835_v57, %v1007_v40  ;;  %v380_v40 = vld [vmem:[#allocation5 + $0x10] sm:$0xff] }
 0x15a   :  { %v768_v21 = vpack.c.bf16 %v381_v11, %v380_v40  ;;  %v404_v57 = vld [vmem:[#allocation5 + $0xd0] sm:$0xff]  ;;  %v391_v40 = vld [vmem:[#allocation5 + $0x68] sm:$0xff] }
 0x15b   :  { %v87_v2 = vmul.f32 %v619_v58, %v78_v59  ;;  %v436_v59 = vld [vmem:[#allocation5 + $0x1d0] sm:$0xff] }
 0x15c   :  { %v837_v6 = vpop.eup %836  ;;  %v814_v0 = vpack.c.bf16 %v437_v61, %v436_v59 }
 0x15d   :  { %v96_v7 = vadd.f32 %v620_v60, %v87_v2  ;;  %v79_v8 = vmul.f32 %v837_v6, %v1011_v44  ;;  %v420_v2 = vld [vmem:[#allocation5 + $0x150] sm:$0xff]  ;;  %v407_v6 = vld [vmem:[#allocation5 + $0xe8] sm:$0xff] }
 0x15e   :  { %v816_v4 = vpack.c.bf16 %v421_v3, %v420_v2 }
 0x15f   :  { %249 = vmatmul.mubr.f32.vlgmr.msra.gmra.mrb[0].mxu0 %v96_v7  ;;  %326 = vmatmul.mubr.f32.vlgmr.msra.gmra.mrb[0].mxu1 %v96_v7  ;;  %v88_v17 = vmul.f32 %v619_v58, %v79_v8  ;;  %v405_v58 = vld [vmem:[#allocation5 + $0xd8] sm:$0xff]  ;;  %v438_v7 = vld [vmem:[#allocation5 + $0x1e0] sm:$0xff]  ;;  %v786_v8 = vpack.c.bf16 %v407_v6, %v406_v5 }
 0x160   :  { %254 = vmatprep.mubr.f32.mxu0 %v932_v22  ;;  %331 = vmatprep.mubr.f32.mxu1 %v932_v22  ;;  %v400_v22 = vld [vmem:[#allocation5 + $0xb0] sm:$0xff] }
 0x161   :  { %v97_v44 = vadd.f32 %v620_v60, %v88_v17  ;;  %765 = vmatpush3.bf16.msra.mxu0 %v764_v9  ;;  %797 = vmatpush3.bf16.msra.mxu1 %v796_v10  ;;  %v774_v34 = vpack.c.bf16 %v401_v32, %v400_v22  ;;  %v782_v60 = vpack.c.bf16 %v405_v58, %v404_v57  ;;  %v439_v9 = vld [vmem:[#allocation5 + $0x1e8] sm:$0xff]  ;;  %v390_v10 = vld [vmem:[#allocation5 + $0x60] sm:$0xff]  ;;  %v409_v17 = vld [vmem:[#allocation5 + $0xf8] sm:$0xff]  ;;  %v170_v32 = vsub.s32 1, %v165_v29 }
 0x162   :  { %767 = vmatprep.subr.bf16.mxu0 %v766_v12  ;;  %799 = vmatprep.subr.bf16.mxu1 %v798_v13  ;;  %v818_v11 = vpack.c.bf16 %v439_v9, %v438_v7  ;;  %v788_v12 = vpack.c.bf16 %v391_v40, %v390_v10  ;;  %v422_v13 = vld [vmem:[#allocation5 + $0x160] sm:$0xff]  ;;  %v790_v19 = vpack.c.bf16 %v409_v17, %v408_v16 }
 0x163   :  { %255 = vmatmul.mubr.f32.gmra.mrb[2].mxu0 %v97_v44  ;;  %332 = vmatmul.mubr.f32.gmra.mrb[2].mxu1 %v97_v44  ;;  %v820_v15 = vpack.c.bf16 %v423_v14, %v422_v13  ;;  %v392_v44 = vld [vmem:[#allocation5 + $0x70] sm:$0xff]  ;;  %v162_v22 = vld [vmem:[%s1052_s4] sm:$0xf] }
 0x164   :  { %v171_v36 = vrot.slane %v162_v22, %v170_v32  ;;  %v179_v37 = vrot.slane %v162_v22, %v178_v33  ;;  %v621_v32 = vld [vmem:[%s1054_s6] ss:$0 sm:$0xff]  ;;  %s898_s6 = scalar_lea.vmem %s607_s13, 256 }
 0x165   :  { %769 = vmatpush3.bf16.msra.mxu0 %v768_v21  ;;  %801 = vmatpush3.bf16.msra.mxu1 %v800_v23  ;;  %v393_v21 = vld [vmem:[#allocation5 + $0x78] sm:$0xff]  ;;  %v822_v23 = vpack.c.bf16 %v441_v20, %v440_v18  ;;  %p899_p2 = scmp.ne.s32.totalorder %s607_s13, %s898_s6  ;;  %p904_p4 = scmp.lt.s32.totalorder %s898_s6, %s898_s6 }
 0x166   :  { %771 = vmatprep.subr.bf16.mxu0 %v770_v25  ;;  %803 = vmatprep.subr.bf16.mxu1 %v802_v26  ;;  %v792_v24 = vpack.c.bf16 %v393_v21, %v392_v44  ;;  %v424_v25 = vld [vmem:[#allocation5 + $0x170] sm:$0xff]  ;;  %v425_v26 = vld [vmem:[#allocation5 + $0x178] sm:$0xff] }
 0x167   :  { %v824_v27 = vpack.c.bf16 %v425_v26, %v424_v25  ;;  %p905_p5 = por %p904_p4, %p903_p3 }
 0x169   :  { %773 = vmatpush3.bf16.msra.mxu0 %v772_v30  ;;  %805 = vmatpush3.bf16.msra.mxu1 %v804_v31  ;;  %v166_v30 = vsub.s32 0, %v165_v29  ;;  %v174_v31 = vsub.s32 2, %v165_v29  ;;  %p906_p6 = pnand %p905_p5, %p899_p2 }
 0x16a   :  { %775 = vmatprep.subr.bf16.mxu0 %v774_v34  ;;  %807 = vmatprep.subr.bf16.mxu1 %v806_v38 }
 0x16b   :  { %v167_v34 = vrot.slane %v162_v22, %v166_v30  ;;  %v175_v35 = vrot.slane %v162_v22, %v174_v31 }
 0x16d   :  { %777 = vmatpush3.bf16.msra.mxu0 %v776_v39  ;;  %809 = vmatpush3.bf16.msra.mxu1 %v808_v43 }
 0x16e   :  { %779 = vmatprep.subr.bf16.mxu0 %v778_v48  ;;  %811 = vmatprep.subr.bf16.mxu1 %v810_v52 }
 0x171   :  { %781 = vmatpush3.bf16.msra.mxu0 %v780_v53  ;;  %813 = vmatpush3.bf16.msra.mxu1 %v812_v56 }
 0x172   :  { %783 = vmatprep.subr.bf16.mxu0 %v782_v60  ;;  %815 = vmatprep.subr.bf16.mxu1 %v814_v0 }
 0x175   :  { %785 = vmatpush3.bf16.msra.mxu0 %v784_v1  ;;  %817 = vmatpush3.bf16.msra.mxu1 %v816_v4 }
 0x176   :  { %787 = vmatprep.subr.bf16.mxu0 %v786_v8  ;;  %819 = vmatprep.subr.bf16.mxu1 %v818_v11 }
 0x179   :  { %789 = vmatpush3.bf16.msra.mxu0 %v788_v12  ;;  %821 = vmatpush3.bf16.msra.mxu1 %v820_v15 }
 0x17a   :  { %791 = vmatprep.subr.bf16.mxu0 %v790_v19  ;;  %823 = vmatprep.subr.bf16.mxu1 %v822_v23 }
 0x17d   :  { %793 = vmatpush3.bf16.msra.mxu0 %v792_v24  ;;  %825 = vmatpush3.bf16.msra.mxu1 %v824_v27 }
 0x232   :  { %v250_v38 = vpop.f32.mrb[0].mxu0  ;;  %v327_v39 = vpop.f32.mrb[0].mxu1 }
 0x233   :  { %v251_v41 = vadd.f32 %v250_v38, %v167_v34  ;;  %v328_v42 = vadd.f32 %v327_v39, %v175_v35  ;;  %v252_v43 = vpop.f32.mrb[1].mxu0  ;;  %v329_v45 = vpop.f32.mrb[1].mxu1 }
 0x234   :  { %v253_v46 = vadd.f32 %v252_v43, %v171_v36  ;;  %v330_v47 = vadd.f32 %v329_v45, %v179_v37 }
 0x235   :  { %v346_v48 = vmul.f32 0.70710677, %v251_v41  ;;  %v348_v49 = vmul.f32 0.70710677, %v328_v42  ;;  %v338_v8 = vmul.f32 0.5, %v251_v41  ;;  %v340_v11 = vmul.f32 0.5, %v328_v42 }
 0x236   :  { %v347_v50 = vmul.f32 0.70710677, %v253_v46  ;;  %v349_v51 = vmul.f32 0.70710677, %v330_v47  ;;  %v256_v52 = vpop.f32.mrb[2].mxu0  ;;  %v333_v53 = vpop.f32.mrb[2].mxu1 }
 0x237   :  { %838 = verf.f32 %v346_v48  ;;  %v257_v54 = vadd.f32 %v256_v52, %v167_v34  ;;  %v334_v55 = vadd.f32 %v333_v53, %v175_v35  ;;  %v258_v56 = vpop.f32.mrb[3].mxu0  ;;  %v335_v57 = vpop.f32.mrb[3].mxu1  ;;  %v339_v6 = vmul.f32 0.5, %v253_v46 }
 0x238   :  { %840 = verf.f32 %v348_v49  ;;  %v259_v58 = vadd.f32 %v258_v56, %v171_v36  ;;  %v336_v59 = vadd.f32 %v335_v57, %v179_v37  ;;  %v341_v9 = vmul.f32 0.5, %v330_v47 }
 0x239   :  { %842 = verf.f32 %v347_v50  ;;  %v350_v60 = vmul.f32 0.70710677, %v257_v54  ;;  %v352_v61 = vmul.f32 0.70710677, %v334_v55  ;;  %v342_v23 = vmul.f32 0.5, %v257_v54 }
 0x23a   :  { %844 = verf.f32 %v349_v51  ;;  %v351_v62 = vmul.f32 0.70710677, %v259_v58  ;;  %v353_v63 = vmul.f32 0.70710677, %v336_v59  ;;  %v343_v44 = vmul.f32 0.5, %v259_v58 }
 0x23b   :  { %846 = verf.f32 %v350_v60  ;;  %v345_v24 = vmul.f32 0.5, %v336_v59  ;;  %v344_v26 = vmul.f32 0.5, %v334_v55 }
 0x23c   :  { %848 = verf.f32 %v352_v61 }
 0x23d   :  { %850 = verf.f32 %v351_v62 }
 0x23e   :  { %852 = verf.f32 %v353_v63 }
 0x241   :  { %v839_v0 = vpop.eup %838 }
 0x242   :  { %v841_v1 = vpop.eup %840  ;;  %v362_v3 = vadd.f32 1.0, %v839_v0 }
 0x243   :  { %v843_v2 = vpop.eup %842  ;;  %v364_v5 = vadd.f32 1.0, %v841_v1 }
 0x244   :  { %v845_v4 = vpop.eup %844  ;;  %v363_v7 = vadd.f32 1.0, %v843_v2  ;;  %v370_v14 = vmul.f32 %v362_v3, %v338_v8 }
 0x245   :  { %v365_v10 = vadd.f32 1.0, %v845_v4  ;;  %v847_v40 = vpop.eup %846  ;;  %v372_v17 = vmul.f32 %v364_v5, %v340_v11 }
 0x246   :  { %v371_v12 = vmul.f32 %v363_v7, %v339_v6  ;;  %v849_v13 = vpop.eup %848  ;;  %v366_v18 = vadd.f32 1.0, %v847_v40 }
 0x247   :  { %v373_v15 = vmul.f32 %v365_v10, %v341_v9  ;;  %v851_v16 = vpop.eup %850  ;;  %v368_v20 = vadd.f32 1.0, %v849_v13 }
 0x248   :  { %513 = vmatprep.mubr.f32.mxu0 %v371_v12  ;;  %v853_v19 = vpop.eup %852  ;;  %v367_v21 = vadd.f32 1.0, %v851_v16  ;;  %v374_v29 = vmul.f32 %v366_v18, %v342_v23 }
 0x249   :  { %588 = vmatprep.mubr.f32.mxu1 %v373_v15  ;;  %514 = vmatmul.mubr.f32.vlgmr.msra.gmra.mrb[4].mxu0 %v370_v14  ;;  %v369_v25 = vadd.f32 1.0, %v853_v19  ;;  %v376_v30 = vmul.f32 %v368_v20, %v344_v26 }
 0x24a   :  { %589 = vmatmul.mubr.f32.vlgmr.msra.gmra.mrb[4].mxu1 %v372_v17  ;;  %v375_v27 = vmul.f32 %v367_v21, %v343_v44 }
 0x24b   :  { %v377_v28 = vmul.f32 %v369_v25, %v345_v24 }
 0x24c   :  { %518 = vmatprep.mubr.f32.mxu0 %v375_v27 }
 0x24d   :  { %593 = vmatprep.mubr.f32.mxu1 %v377_v28  ;;  %519 = vmatmul.mubr.f32.gmra.mrb[6].mxu0 %v374_v29 }
 0x24e   :  { %594 = vmatmul.mubr.f32.gmra.mrb[6].mxu1 %v376_v30 }
 0x31c   :  { %v654_v31 = vpop.f32.mrb[4].mxu0 }
 0x31d   :  { %v692_v22 = vpop.f32.mrb[4].mxu1  ;;  %v655_v33 = vpop.f32.mrb[5].mxu0 }
 0x31e   :  { %v656_v34 = vadd.f32 %v655_v33, %v654_v31  ;;  %v693_v35 = vpop.f32.mrb[5].mxu1 }
 0x31f   :  { %v694_v36 = vadd.f32 %v693_v35, %v692_v22 }
 0x320   :  { %v516_v37 = vadd.f32 %v656_v34, %v621_v32  ;;  %v657_v38 = vpop.f32.mrb[6].mxu0 }
 0x321   :  { %v695_v41 = vpop.f32.mrb[6].mxu1  ;;  %v658_v42 = vpop.f32.mrb[7].mxu0 }
 0x322   :  { %v591_v39 = vadd.f32 %v694_v36, %v516_v37  ;;  %v659_v43 = vadd.f32 %v658_v42, %v657_v38  ;;  %v696_v45 = vpop.f32.mrb[7].mxu1 }
 0x323   :  { %v697_v46 = vadd.f32 %v696_v45, %v695_v41 }
 0x324   :  { %599 = vst [vmem:[#allocation7] sm:$0xff] %v591_v39  ;;  %v521_v47 = vadd.f32 %v659_v43, %v621_v32 }
 0x326   :  { %v596_v48 = vadd.f32 %v697_v46, %v521_v47 }
 0x328   :  { %600 = vst [vmem:[#allocation7 + $0x8] sm:$0xff] %v596_v48 }
 0x329   :  { %909 = shalt.err (!%p906_p6)
}
 0x32a   :  { %s910_s16 = scalar_lea.hbm %s1055_s7, 256 }
 0x32b   :  { %p911_p7 = scmp.ne.s32.totalorder %s1055_s7, %s910_s16  ;;  %p914_p8 = scmp.lt.u32.totalorder %s910_s16, %s1055_s7 }
 0x32d   :  { %p916_p9 = pnand %p914_p8, %p911_p7 }
 0x32f   :  { %919 = shalt.err (!%p916_p9)
}
 0x330   :  { %612 = dma.vmem_to_hbm [thread:$0]  %s607_s13, 256, %s1055_s7, [#allocation4], %s930_s3, %s930_s3, %s931_s25  }
 0x331   :  { %924 = dma.done.wait [#allocation4], 256  }
 0x332   :  { %925 = vsyncadd [#allocation4], 4294967040 }
 0x333   :  { %616 = vsyncpa [#allocation3], 1 }
 0x334   :  { %617 = vsyncpa [#allocation6], 1 }
 0x335   :  { %618 = vsyncpa [#allocation4], 1 }

</bundles_post_ra>
